<compile_context>
chip_gen: v6e
topology: v6e:2x2x1
jax: 0.10.0
libtpu: 0.0.40
codegen_flags: <defaults>
</compile_context>

<pallas_src>
import jax
import jax.numpy as jnp
from jax.experimental import pallas as pl
from jax.experimental.pallas import tpu as pltpu


def _build_pe(embed_dim: int, max_len: int, dtype=jnp.float32):
    """Deterministic buffer construction (glue, mirrors nn.Module.__init__)."""
    pos = jnp.arange(max_len, dtype=jnp.float32)
    i = jnp.arange(0, embed_dim, 2, dtype=jnp.float32)
    pos_g, i_g = jnp.meshgrid(pos, i, indexing="ij")          # (max_len, ceil(E/2))
    arg = pos_g / (10000.0 ** (i_g / embed_dim))
    pe = jnp.zeros((max_len, embed_dim), dtype=jnp.float32)
    pe = pe.at[:, ::2].set(jnp.sin(arg))
    n_cos = arg.shape[1] - (embed_dim % 2)
    pe = pe.at[:, 1::2].set(jnp.cos(arg)[:, :n_cos])
    return pe.astype(dtype)                                    # (max_len, E)


def _pos_enc_kernel(x_ref, pe_ref, o_ref):
    # x_ref / o_ref: (TL, TE) slab for one (seq, embed, batch) grid point (batch squeezed).
    # pe_ref:        (TL, TE) positional-encoding tile, shared across batch.
    o_ref[...] = x_ref[...] + pe_ref[...].astype(x_ref.dtype)


def _pos_enc_flat_kernel(x_ref, pe_ref, o_ref):
    # Lane-dense small-shape path: x_ref/o_ref (B, L*E); pe_ref (1, L*E) broadcast over batch.
    o_ref[...] = x_ref[...] + pe_ref[...]


def _block_target_bytes() -> int:
    """Per-block byte target, generation-aware."""
    try:
        info = pltpu.get_tpu_info()
        vmem = int(getattr(info, "vmem_capacity_bytes", 128 << 20))
    except Exception:  # CPU / unknown backend: safe default
        vmem = 128 << 20
    # v7x (64 MiB VMEM/TC, 3.2 TB/s HBM): bigger blocks to amortize the ~0.35us/step cost.
    # v5e/v6e (128 MiB VMEM): ~2 MiB blocks already sit at ~85% of HBM roofline.
    return (4 << 20) if vmem <= (64 << 20) else (2 << 20)


def _choose_tiles(L: int, E: int, max_len: int, itemsize: int, target_bytes: int):
    """Pick (TL, TE): sublane-aligned sequence tile, lane-aligned (or whole) embed tile."""
    sub = {1: 32, 2: 16, 4: 8}.get(itemsize, 8)
    # Split the lane axis only when even a minimal-row block would bust the budget
    # (very wide E), and only in 128-multiples.  Otherwise keep E whole.
    TE = E
    if E % 128 == 0 and sub * E * itemsize > target_bytes:
        TE = max(128, min(E, (target_bytes // (sub * itemsize)) // 128 * 128))
    rows = max(sub, (target_bytes // max(1, TE * itemsize)) // sub * sub)
    if rows >= L:
        if L % sub == 0 or L == max_len:
            return L, TE                       # whole sequence fits one block
        return -(-L // sub) * sub, TE          # round up to sublane multiple; overhang masked
    # Accept a divisor of L only if it stays >= ~half the target (never collapse to
    # tiny tiles for awkward L); otherwise take the ragged, masked tail block.
    floor = max(sub, (rows // 2) // sub * sub)
    t = rows
    while t >= floor:
        if L % t == 0:
            return t, TE
        t -= sub
    return rows, TE


def positional_encoding(x: jax.Array, pe_full: jax.Array, *, donate_x: bool = False) -> jax.Array:
    """x: (B, L, E); pe_full: (max_len, E) positional-encoding buffer.  Returns x + pe[:L]."""
    B, L, E = x.shape
    max_len, E_pe = pe_full.shape
    if E_pe != E:
        raise ValueError(f"embed_dim mismatch: x has {E}, pe has {E_pe}")
    if L > max_len:
        raise ValueError(f"sequence length {L} exceeds positional-encoding max_len {max_len}")

    itemsize = jnp.dtype(x.dtype).itemsize

    # --- Small / narrow-E path: collapse (L, E) into one lane-dense last dim so stores
    # are unmasked full-lane vst (E < 128 would otherwise waste up to 4x lanes).
    flat_bytes = (B + 1) * L * E * itemsize
    if E % 128 != 0 and (L * E) % 128 == 0 and flat_bytes <= (2 << 20):
        LE = L * E
        pe_flat = pe_full[:L].astype(x.dtype).reshape(1, LE)   # tiny one-off reshape
        out = pl.pallas_call(
            _pos_enc_flat_kernel,
            out_shape=jax.ShapeDtypeStruct((B, LE), x.dtype),
            grid=(1,),
            in_specs=[pl.BlockSpec((B, LE), lambda i: (0, 0)),
                      pl.BlockSpec((1, LE), lambda i: (0, 0))],
            out_specs=pl.BlockSpec((B, LE), lambda i: (0, 0)),
        )(x.reshape(B, LE), pe_flat)
        return out.reshape(B, L, E)

    # --- Main tiled path: pe_full goes in untouched (no wrapper slice/cast HBM pass).
    target = _block_target_bytes()
    TL, TE = _choose_tiles(L, E, max_len, itemsize, target)
    l_tiles = pl.cdiv(L, TL)
    e_tiles = pl.cdiv(E, TE)
    block_bytes = TL * TE * max(itemsize, jnp.dtype(pe_full.dtype).itemsize)
    # 3 streams x 2 pipeline buffers x block + headroom; explicit so v5e's 16 MiB
    # scoped default cannot squeeze us.  <=32 MiB is safe on every generation.
    vmem_limit = int(min(32 << 20, 6 * block_bytes + (8 << 20)))

    return pl.pallas_call(
        _pos_enc_kernel,
        out_shape=jax.ShapeDtypeStruct((B, L, E), x.dtype),
        grid_spec=pltpu.PrefetchScalarGridSpec(
            num_scalar_prefetch=0,
            # Batch is the innermost loop; pe's block index is constant across it, so
            # each pe tile is fetched once per (seq, embed) tile, not B times.
            # TODO(synk): verify in xprof/Mosaic that the pe-block revisit dedup and the
            # v7x cross-TensorCore sharding of the parallel axes actually kick in.
            grid=(l_tiles, e_tiles, B),
            in_specs=[
                pl.BlockSpec((pl.Squeezed(), TL, TE), lambda l, e, b: (b, l, e)),  # x tile
                pl.BlockSpec((TL, TE), lambda l, e, b: (l, e)),                    # pe tile
            ],
            out_specs=pl.BlockSpec((pl.Squeezed(), TL, TE), lambda l, e, b: (b, l, e)),
        ),
        compiler_params=pltpu.CompilerParams(
            dimension_semantics=("parallel", "parallel", "parallel"),
            vmem_limit_bytes=vmem_limit,
        ),
        # Optional: reuse x's HBM buffer for the output when the caller no longer needs x.
        input_output_aliases=({0: 0} if donate_x else {}),
    )(x, pe_full)


def positional_encoding_ref(x, pe_full):
    L = x.shape[1]
    return x + pe_full[None, :L, :].astype(x.dtype)


if __name__ == "__main__":
    key = jax.random.PRNGKey(0)

    # --- small shape consistent with the module: (B, L, E) = (2, 8, 32) ---
    # Exercises the lane-dense flattened (B, L*E) path.
    B, L, E, max_len = 2, 8, 32, 64
    x = jax.random.normal(key, (B, L, E), dtype=jnp.float32)
    pe_full = _build_pe(E, max_len)
    out = jax.block_until_ready(positional_encoding(x, pe_full))
    ref = positional_encoding_ref(x, pe_full)
    assert out.shape == (B, L, E)
    assert jnp.allclose(out, ref, atol=1e-6, rtol=1e-6)

    # --- moderate shape exercising the tiled main path (TL < L), pe passed unsliced ---
    B2, L2, E2, max_len2 = 2, 2048, 512, 4096
    x2 = jax.random.normal(jax.random.PRNGKey(1), (B2, L2, E2), dtype=jnp.float32)
    pe_full2 = _build_pe(E2, max_len2)
    out2 = jax.block_until_ready(positional_encoding(x2, pe_full2))
    ref2 = positional_encoding_ref(x2, pe_full2)
    assert jnp.allclose(out2, ref2, atol=1e-6, rtol=1e-6)

    # --- awkward L (no large divisor) exercising the ragged-masked-tail tiling ---
    B3, L3, E3, max_len3 = 2, 2100, 512, 4096
    x3 = jax.random.normal(jax.random.PRNGKey(2), (B3, L3, E3), dtype=jnp.float32)
    pe_full3 = _build_pe(E3, max_len3)
    out3 = jax.block_until_ready(positional_encoding(x3, pe_full3))
    ref3 = positional_encoding_ref(x3, pe_full3)
    assert jnp.allclose(out3, ref3, atol=1e-6, rtol=1e-6)

    print("KERNEL_OK")
</pallas_src>

<mosaic_0001>
module attributes {stable_mosaic.version = 11 : i64} {
  func.func @_pos_enc_flat_kernel(%arg0: i32, %arg1: memref<2x256xf32, #tpu.memory_space<vmem>>, %arg2: memref<1x256xf32, #tpu.memory_space<vmem>>, %arg3: memref<2x256xf32, #tpu.memory_space<vmem>>) attributes {dimension_semantics = [#tpu.dimension_semantics<arbitrary>], iteration_bounds = array<i64: 1>, scalar_prefetch = 0 : i64, scratch_operands = 0 : i64, tpu.core_type = #tpu.core_type<tc>, window_params = [{pipeline_mode = #tpu.pipeline_mode<synchronous>, transform_indices = @transform_0, window_bounds = array<i64: 2, 256>}, {pipeline_mode = #tpu.pipeline_mode<synchronous>, transform_indices = @transform_1, window_bounds = array<i64: 1, 256>}, {pipeline_mode = #tpu.pipeline_mode<synchronous>, transform_indices = @transform_2, window_bounds = array<i64: 2, 256>}]} {
    %c0 = arith.constant 0 : index
    %c0_0 = arith.constant 0 : index
    %0 = vector.load %arg1[%c0, %c0_0] : memref<2x256xf32, #tpu.memory_space<vmem>>, vector<2x256xf32>
    %c0_1 = arith.constant 0 : index
    %c0_2 = arith.constant 0 : index
    %1 = vector.load %arg2[%c0_1, %c0_2] : memref<1x256xf32, #tpu.memory_space<vmem>>, vector<1x256xf32>
    %2 = vector.broadcast %1 : vector<1x256xf32> to vector<2x256xf32>
    %3 = arith.addf %0, %2 : vector<2x256xf32>
    %c0_3 = arith.constant 0 : index
    %c0_4 = arith.constant 0 : index
    %4 = vector.load %arg3[%c0_3, %c0_4] : memref<2x256xf32, #tpu.memory_space<vmem>>, vector<2x256xf32>
    tpu.vector_store %arg3[%c0_3, %c0_4], %3 {strides = array<i32>} : memref<2x256xf32, #tpu.memory_space<vmem>>, vector<2x256xf32>,
    return
  }
  func.func @transform_0(%arg0: i32) -> (i32, i32) {
    %c0_i32 = arith.constant 0 : i32
    %c0_i32_0 = arith.constant 0 : i32
    %c0_i32_1 = arith.constant 0 : i32
    return %c0_i32, %c0_i32_0 : i32, i32
  }
  func.func @transform_1(%arg0: i32) -> (i32, i32) {
    %c0_i32 = arith.constant 0 : i32
    %c0_i32_0 = arith.constant 0 : i32
    %c0_i32_1 = arith.constant 0 : i32
    return %c0_i32, %c0_i32_0 : i32, i32
  }
  func.func @transform_2(%arg0: i32) -> (i32, i32) {
    %c0_i32 = arith.constant 0 : i32
    %c0_i32_0 = arith.constant 0 : i32
    %c0_i32_1 = arith.constant 0 : i32
    return %c0_i32, %c0_i32_0 : i32, i32
  }
}

</mosaic_0001>

<bundles_post_ra>
// kernel: tpu_custom_call.1
= control target key start
LH: loop header
LB: loop body
LE: loop exit
PB: predicated region body
PF: predicated region fallthrough
CT: control target
= control target key end

     0   :  { %7 = vsyncpa [#allocation3], 0  ;;  %s172_s0 = inlined_call_operand.hbm [shape: f32[2,256], index: 0, kind: input, shape index: {}]   ;;  %s173_s1 = inlined_call_operand.hbm [shape: f32[1,256], index: 1, kind: input, shape index: {}]   ;;  %s174_s2 = inlined_call_operand.hbm [shape: f32[2,256], index: 2, kind: output, shape index: {}]  }
   0x1   :  { %8 = vsyncpa [#allocation6], 0 }
   0x2   :  { %9 = vsyncpa [#allocation4], 0  ;;  %s144_s9 = smov [#allocation2]   ;;  %s145_s11 = smov [#allocation5]  }
   0x3   :  { %s16_s10 = sshll.u32 %s144_s9, 4  ;;  %s26_s12 = sshll.u32 %s145_s11, 4  ;;  %s17_s10 = int_to_ptr.vmem [resolvable:$true] %s16_s10  ;;  %s27_s12 = int_to_ptr.vmem [resolvable:$true] %s26_s12 }
   0x4   :  { %s86_s13 = scalar_lea.vmem %s17_s10, 64  ;;  %p91_p1 = scmp.lt.s32.totalorder %s17_s10, %s17_s10 }
   0x5   :  { %p87_p0 = scmp.ne.s32.totalorder %s17_s10, %s86_s13  ;;  %p92_p2 = scmp.lt.s32.totalorder %s86_s13, %s86_s13 }
   0x7   :  { %p93_p3 = por %p92_p2, %p91_p1 }
   0x9   :  { %p94_p4 = pnand %p93_p3, %p87_p0 }
   0xb   :  { %97 = shalt.err (!%p94_p4)
}
   0xc   :  { %19 = dma.hbm_to_vmem [thread:$0]  %s172_s0, 64, %s17_s10, [#allocation3]  }
   0xd   :  { %s106_s16 = scalar_lea.vmem %s27_s12, 32  ;;  %p111_p6 = scmp.lt.s32.totalorder %s27_s12, %s27_s12 }
   0xe   :  { %p107_p5 = scmp.ne.s32.totalorder %s27_s12, %s106_s16  ;;  %p112_p7 = scmp.lt.s32.totalorder %s106_s16, %s106_s16 }
  0x10   :  { %p113_p8 = por %p112_p7, %p111_p6 }
  0x12   :  { %p114_p9 = pnand %p113_p8, %p107_p5 }
  0x14   :  { %117 = shalt.err (!%p114_p9)
}
  0x15   :  { %29 = dma.hbm_to_vmem [thread:$0]  %s173_s1, 32, %s27_s12, [#allocation6]  }
  0x16   :  { %138 = dma.done.wait [#allocation3], 64  }
  0x17   :  { %139 = vsyncadd [#allocation3], 4294967232 }
  0x18   :  { %140 = dma.done.wait [#allocation6], 32  }
  0x19   :  { %141 = vsyncadd [#allocation6], 4294967264  ;;  %v39_v0 = vlaneseq  ;;  %v146_v1 = vmov 1983009808   ;;  %v37_v7 = vld [vmem:[#allocation5] sm:$0x3] }
  0x1a   :  { %v49_v2 = vunpack.c.l.s4 %v146_v1  ;;  %v36_v12 = vld [vmem:[#allocation2] sm:$0xf]  ;;  %s147_s0 = smov [#allocation7]  }
  0x1b   :  { %v40_v3 = vshrl.u32 %v39_v0, 7  ;;  %s64_s19 = sshll.u32 %s147_s0, 4  ;;  %s65_s19 = int_to_ptr.vmem [resolvable:$true] %s64_s19 }
  0x1c   :  { %v50_v6 = vunpack.c.0.s8 %v49_v2  ;;  %s118_s1 = scalar_lea.vmem %s65_s19, 64  ;;  %p123_p11 = scmp.lt.s32.totalorder %s65_s19, %s65_s19 }
  0x1d   :  { %v41_v4 = vsub.s32 0, %v40_v3  ;;  %v45_v5 = vsub.s32 1, %v40_v3  ;;  %p119_p10 = scmp.ne.s32.totalorder %s65_s19, %s118_s1  ;;  %p124_p12 = scmp.lt.s32.totalorder %s118_s1, %s118_s1 }
  0x1e   :  { %v53_v10 = vsub.s32 %v50_v6, %v40_v3 }
  0x1f   :  { %v42_v8 = vrot.slane %v37_v7, %v41_v4  ;;  %v46_v9 = vrot.slane %v37_v7, %v45_v5  ;;  %p125_p13 = por %p124_p12, %p123_p11 }
  0x21   :  { %v47_v11 = vcombine.low %v42_v8, %v46_v9  ;;  %p126_p0 = pnand %p125_p13, %p119_p10 }
  0x23   :  { %v54_v13 = vrot.slane %v47_v11, %v53_v10 }
  0x25   :  { %v56_v14 = vadd.f32 %v54_v13, %v36_v12 }
  0x27   :  { %57 = vst [vmem:[#allocation7] sm:$0xf] %v56_v14 }
  0x28   :  { %129 = shalt.err (!%p126_p0)
}
  0x29   :  { %67 = dma.vmem_to_hbm [thread:$0]  %s65_s19, 64, %s174_s2, [#allocation4]  }
  0x2a   :  { %142 = dma.done.wait [#allocation4], 64  }
  0x2b   :  { %143 = vsyncadd [#allocation4], 4294967232 }
  0x2c   :  { %71 = vsyncpa [#allocation3], 1 }
  0x2d   :  { %72 = vsyncpa [#allocation6], 1 }
  0x2e   :  { %73 = vsyncpa [#allocation4], 1 }

</bundles_post_ra>
